<compile_context>
chip_gen: v7x
topology: tpu7x:2x2x1
jax: 0.10.0
libtpu: 0.0.40
codegen_flags: <defaults>
</compile_context>

<pallas_src>
import functools

import jax
import jax.numpy as jnp
from jax import lax
from jax.experimental import pallas as pl
from jax.experimental.pallas import tpu as pltpu

LN_EPS = 1e-5


def _pick_chunk(n, cap):
    """Largest chunk <= cap that divides n and is a multiple of 8 (else n)."""
    if n <= cap:
        return n
    for c in range(cap, 0, -1):
        if n % c == 0 and c % 8 == 0:
            return c
    return n


# --------------------------------------------------------------------------
# Pre-pass: gi = LayerNorm_in(x) @ W_ih^T + (b_ih + [b_hr, b_hz, 0])   (all t)
# --------------------------------------------------------------------------
def _gi_kernel(x_ref, w_ih_ref, b_ref, g_in_ref, bt_in_ref, gi_ref):
    x = x_ref[...].astype(jnp.float32)                      # (Rt, I)
    mu = jnp.mean(x, axis=-1, keepdims=True)
    d = x - mu
    var = jnp.mean(d * d, axis=-1, keepdims=True)
    xn = d * lax.rsqrt(var + LN_EPS) * g_in_ref[...] + bt_in_ref[...]
    gi_ref[...] = (jnp.dot(xn, w_ih_ref[...],
                           preferred_element_type=jnp.float32) + b_ref[...])


# --------------------------------------------------------------------------
# Serial recurrence: only gh = h @ W_hh^T + gate math + output LayerNorm.
# --------------------------------------------------------------------------
def _gru_rec_kernel(gi_ref, h0_ref, w_hh_ref, b_hn_ref, g_out_ref, b_out_ref,
                    out_ref, hN_ref, h_scratch, *, H):
    c = pl.program_id(1)                      # time-chunk index (serial axis)
    T = gi_ref.shape[1]
    Hp = h_scratch.shape[-1]

    @pl.when(c == 0)
    def _init():
        h_scratch[...] = h0_ref[...].astype(jnp.float32)

    h = h_scratch[...]                        # (Bb, Hp) f32, pad cols stay 0
    w_hh = w_hh_ref[...]                      # (Hp, 3Hp)
    b_hn = b_hn_ref[...]                      # (1, Hp)
    g_out = g_out_ref[...]                    # (1, Hp)  (pad cols = 0)
    b_out = b_out_ref[...]                    # (1, Hp)  (pad cols = 0)

    inv_h = jnp.float32(1.0 / H)
    pad_n = jnp.float32(Hp - H)

    # Unrolled time loop inside the chunk (static indices -> free ref views).
    for t in range(T):
        gi_t = gi_ref[:, t, :]                                    # (Bb, 3Hp)
        gh = jnp.dot(h, w_hh, preferred_element_type=jnp.float32)  # (Bb, 3Hp)

        # 128-lane-aligned gate slices (PyTorch order r, z, n).
        r = jax.nn.sigmoid(gi_t[:, 0:Hp] + gh[:, 0:Hp])
        z = jax.nn.sigmoid(gi_t[:, Hp:2 * Hp] + gh[:, Hp:2 * Hp])
        n = jnp.tanh(gi_t[:, 2 * Hp:3 * Hp] + r * (gh[:, 2 * Hp:3 * Hp] + b_hn))
        h = (1.0 - z) * n + z * h

        # Output LayerNorm over the real H columns (padded h columns are 0).
        mu = jnp.sum(h, axis=-1, keepdims=True) * inv_h
        cen = h - mu
        ssq = jnp.sum(cen * cen, axis=-1, keepdims=True) - pad_n * mu * mu
        o = cen * lax.rsqrt(ssq * inv_h + LN_EPS) * g_out + b_out

        out_ref[:, t, :] = o.astype(out_ref.dtype)            # lane-dense store

    h_scratch[...] = h

    @pl.when(c == pl.num_programs(1) - 1)
    def _final():
        hN_ref[...] = h.astype(hN_ref.dtype)    # final (un-normalized) hidden


# --------------------------------------------------------------------------
# Wrapper
# --------------------------------------------------------------------------
def gru_recurrent_forward(x, h, params, action=None, reward=None, *,
                          time_chunk=None):
    """x: (B, S, I) f32, h: (1, B, H) f32 -> (out (B, S, H), h (1, B, H))."""
    del action, reward  # unused by the GRU path (matches PyTorch forward)
    B, S, I = x.shape
    H = h.shape[-1]
    Hp = 128 * pl.cdiv(H, 128)                 # lane-dense, gate-aligned padding
    H3p = 3 * Hp

    # ---- weight / bias preparation (padded, gate-aligned) ----
    def pad_gate_cols(m):                       # (D, 3H) -> (D, 3Hp)
        parts = []
        for g in range(3):
            blk = m[:, g * H:(g + 1) * H]
            parts.append(jnp.pad(blk, ((0, 0), (0, Hp - H))))
        return jnp.concatenate(parts, axis=1)

    w_ihT_p = pad_gate_cols(params["w_ih"].T)                       # (I, 3Hp)
    w_hhT_p = jnp.pad(pad_gate_cols(params["w_hh"].T),
                      ((0, Hp - H), (0, 0)))                        # (Hp, 3Hp)

    b_ih, b_hh = params["b_ih"], params["b_hh"]
    # r/z biases from b_hh fold into the pre-pass; b_hn must stay inside r*( ).
    b_fused = jnp.concatenate([b_ih[0:H] + b_hh[0:H],
                               b_ih[H:2 * H] + b_hh[H:2 * H],
                               b_ih[2 * H:3 * H]])
    b_fused_p = pad_gate_cols(b_fused.reshape(1, 3 * H))            # (1, 3Hp)
    b_hn_p = jnp.pad(b_hh[2 * H:3 * H], (0, Hp - H)).reshape(1, Hp)

    h0_p = jnp.pad(h[0], ((0, 0), (0, Hp - H)))                     # (B, Hp)
    g_out_p = jnp.pad(params["ln_out_w"], (0, Hp - H)).reshape(1, Hp)
    bt_out_p = jnp.pad(params["ln_out_b"], (0, Hp - H)).reshape(1, Hp)
    g_in = params["ln_in_w"].reshape(1, I)
    bt_in = params["ln_in_b"].reshape(1, I)

    # ---- pre-pass: one big batched matmul over all S*B rows ----
    R = B * S
    Rt = _pick_chunk(R, 512)
    x2d = x.reshape(R, I)                      # metadata reshape, no transpose
    gi2d = pl.pallas_call(
        _gi_kernel,
        out_shape=jax.ShapeDtypeStruct((R, H3p), jnp.float32),
        grid_spec=pltpu.PrefetchScalarGridSpec(
            num_scalar_prefetch=0,
            grid=(R // Rt,),
            in_specs=[
                pl.BlockSpec((Rt, I), lambda r: (r, 0)),      # x rows
                pl.BlockSpec((I, H3p), lambda r: (0, 0)),     # W_ih^T (padded)
                pl.BlockSpec((1, H3p), lambda r: (0, 0)),     # fused bias
                pl.BlockSpec((1, I), lambda r: (0, 0)),       # ln_in weight
                pl.BlockSpec((1, I), lambda r: (0, 0)),       # ln_in bias
            ],
            out_specs=pl.BlockSpec((Rt, H3p), lambda r: (r, 0)),
        ),
        compiler_params=pltpu.CompilerParams(
            dimension_semantics=("parallel",)),
    )(x2d, w_ihT_p, b_fused_p, g_in, bt_in)
    gi = gi2d.reshape(B, S, H3p)               # metadata reshape, no transpose

    # ---- recurrent kernel: time-chunked, batch-parallel grid ----
    if time_chunk is None:
        T = _pick_chunk(S, 32)
    else:
        T = time_chunk
        assert S % T == 0 and (T == S or T % 8 == 0), "bad time_chunk"
    Bb = _pick_chunk(B, 8)                      # batch block (v7x 2nd TC if big)

    out_p, h_last_p = pl.pallas_call(
        functools.partial(_gru_rec_kernel, H=H),
        out_shape=(
            jax.ShapeDtypeStruct((B, S, Hp), x.dtype),
            jax.ShapeDtypeStruct((B, Hp), jnp.float32),
        ),
        grid_spec=pltpu.PrefetchScalarGridSpec(
            num_scalar_prefetch=0,
            grid=(B // Bb, S // T),
            in_specs=[
                pl.BlockSpec((Bb, T, H3p), lambda b, c: (b, c, 0)),  # gi chunk
                pl.BlockSpec((Bb, Hp), lambda b, c: (b, 0)),         # h0
                pl.BlockSpec((Hp, H3p), lambda b, c: (0, 0)),        # W_hh^T
                pl.BlockSpec((1, Hp), lambda b, c: (0, 0)),          # b_hn
                pl.BlockSpec((1, Hp), lambda b, c: (0, 0)),          # ln_out w
                pl.BlockSpec((1, Hp), lambda b, c: (0, 0)),          # ln_out b
            ],
            out_specs=[
                pl.BlockSpec((Bb, T, Hp), lambda b, c: (b, c, 0)),   # out chunk
                pl.BlockSpec((Bb, Hp), lambda b, c: (b, 0)),         # final h
            ],
            scratch_shapes=[pltpu.VMEM((Bb, Hp), jnp.float32)],
        ),
        compiler_params=pltpu.CompilerParams(
            # time axis carries the hidden state -> "arbitrary"; batch is parallel.
            dimension_semantics=("parallel", "arbitrary"),
            # explicit budget: safe on v7x's 64 MiB VMEM as well as v5e/v6e.
            vmem_limit_bytes=32 * 1024 * 1024,
        ),
    )(gi, h0_p, w_hhT_p, b_hn_p, g_out_p, bt_out_p)

    out = out_p[:, :, :H]                      # drop lane padding
    h_last = h_last_p[:, :H][None]             # (1, B, H)
    return out, h_last


# --------------------------------------------------------------------------
# Pure-JAX reference (PyTorch semantics) for the sanity check.
# --------------------------------------------------------------------------
def _reference_forward(x, h, params):
    def layernorm(v, g, b):
        mu = jnp.mean(v, axis=-1, keepdims=True)
        var = jnp.mean((v - mu) ** 2, axis=-1, keepdims=True)
        return (v - mu) * lax.rsqrt(var + LN_EPS) * g + b

    xn = layernorm(x, params["ln_in_w"], params["ln_in_b"])
    H = h.shape[-1]
    w_ih, w_hh = params["w_ih"], params["w_hh"]
    b_ih, b_hh = params["b_ih"], params["b_hh"]

    def step(h_prev, x_t):
        gi = x_t @ w_ih.T + b_ih
        gh = h_prev @ w_hh.T + b_hh
        i_r, i_z, i_n = gi[:, :H], gi[:, H:2 * H], gi[:, 2 * H:]
        h_r, h_z, h_n = gh[:, :H], gh[:, H:2 * H], gh[:, 2 * H:]
        r = jax.nn.sigmoid(i_r + h_r)
        z = jax.nn.sigmoid(i_z + h_z)
        n = jnp.tanh(i_n + r * h_n)
        h_new = (1.0 - z) * n + z * h_prev
        return h_new, h_new

    h_last, outs = lax.scan(step, h[0], jnp.transpose(xn, (1, 0, 2)))
    out = jnp.transpose(outs, (1, 0, 2))
    out = layernorm(out, params["ln_out_w"], params["ln_out_b"])
    return out, h_last[None]


def init_params(key, input_size, hidden_size):
    ks = jax.random.split(key, 4)
    bound = 1.0 / jnp.sqrt(hidden_size)
    return {
        "w_ih": jax.random.uniform(ks[0], (3 * hidden_size, input_size),
                                   jnp.float32, -bound, bound),
        "w_hh": jax.random.uniform(ks[1], (3 * hidden_size, hidden_size),
                                   jnp.float32, -bound, bound),
        "b_ih": jax.random.uniform(ks[2], (3 * hidden_size,),
                                   jnp.float32, -bound, bound),
        "b_hh": jax.random.uniform(ks[3], (3 * hidden_size,),
                                   jnp.float32, -bound, bound),
        "ln_in_w": jnp.ones((input_size,), jnp.float32),
        "ln_in_b": jnp.zeros((input_size,), jnp.float32),
        "ln_out_w": jnp.ones((hidden_size,), jnp.float32),
        "ln_out_b": jnp.zeros((hidden_size,), jnp.float32),
    }


if __name__ == "__main__":
    B, S, I, H = 2, 16, 16, 32   # S=16 with time_chunk=8 exercises 2 time chunks

    key = jax.random.PRNGKey(0)
    k_x, k_h, k_p = jax.random.split(key, 3)
    x = jax.random.normal(k_x, (B, S, I), jnp.float32)
    h0 = jax.random.normal(k_h, (1, B, H), jnp.float32)
    params = init_params(k_p, I, H)

    out, h_last = gru_recurrent_forward(x, h0, params, time_chunk=8)
    out, h_last = jax.block_until_ready((out, h_last))

    out_ref, h_ref = _reference_forward(x, h0, params)
    assert out.shape == (B, S, H) and h_last.shape == (1, B, H)
    assert jnp.allclose(out, out_ref, atol=1e-4, rtol=1e-4), \
        float(jnp.max(jnp.abs(out - out_ref)))
    assert jnp.allclose(h_last, h_ref, atol=1e-4, rtol=1e-4), \
        float(jnp.max(jnp.abs(h_last - h_ref)))

    print("KERNEL_OK")
</pallas_src>

<mosaic_0001>
module attributes {stable_mosaic.version = 11 : i64} {
  func.func @_gi_kernel(%arg0: i32, %arg1: memref<32x16xf32, #tpu.memory_space<vmem>>, %arg2: memref<16x384xf32, #tpu.memory_space<vmem>>, %arg3: memref<1x384xf32, #tpu.memory_space<vmem>>, %arg4: memref<1x16xf32, #tpu.memory_space<vmem>>, %arg5: memref<1x16xf32, #tpu.memory_space<vmem>>, %arg6: memref<32x384xf32, #tpu.memory_space<vmem>>) attributes {dimension_semantics = [#tpu.dimension_semantics<parallel>], iteration_bounds = array<i64: 1>, scalar_prefetch = 0 : i64, scratch_operands = 0 : i64, tpu.core_type = #tpu.core_type<tc>, window_params = [{transform_indices = @transform_0, window_bounds = array<i64: 32, 16>}, {pipeline_mode = #tpu.pipeline_mode<synchronous>, transform_indices = @transform_1, window_bounds = array<i64: 16, 384>}, {pipeline_mode = #tpu.pipeline_mode<synchronous>, transform_indices = @transform_2, window_bounds = array<i64: 1, 384>}, {pipeline_mode = #tpu.pipeline_mode<synchronous>, transform_indices = @transform_3, window_bounds = array<i64: 1, 16>}, {pipeline_mode = #tpu.pipeline_mode<synchronous>, transform_indices = @transform_4, window_bounds = array<i64: 1, 16>}, {transform_indices = @transform_5, window_bounds = array<i64: 32, 384>}]} {
    %c0 = arith.constant 0 : index
    %c0_0 = arith.constant 0 : index
    %0 = vector.load %arg1[%c0, %c0_0] : memref<32x16xf32, #tpu.memory_space<vmem>>, vector<32x16xf32>
    %cst = arith.constant dense<0.000000e+00> : vector<32xf32>
    %1 = vector.multi_reduction <add>, %0, %cst [1] : vector<32x16xf32> to vector<32xf32>
    %2 = vector.shape_cast %1 : vector<32xf32> to vector<32x1xf32>
    %cst_1 = arith.constant 1.600000e+01 : f32
    %3 = vector.broadcast %cst_1 : f32 to vector<32x1xf32>
    %4 = arith.divf %2, %3 : vector<32x1xf32>
    %5 = vector.broadcast %4 : vector<32x1xf32> to vector<32x16xf32>
    %6 = arith.subf %0, %5 : vector<32x16xf32>
    %7 = arith.mulf %6, %6 : vector<32x16xf32>
    %cst_2 = arith.constant dense<0.000000e+00> : vector<32xf32>
    %8 = vector.multi_reduction <add>, %7, %cst_2 [1] : vector<32x16xf32> to vector<32xf32>
    %9 = vector.shape_cast %8 : vector<32xf32> to vector<32x1xf32>
    %cst_3 = arith.constant 1.600000e+01 : f32
    %10 = vector.broadcast %cst_3 : f32 to vector<32x1xf32>
    %11 = arith.divf %9, %10 : vector<32x1xf32>
    %cst_4 = arith.constant 9.99999974E-6 : f32
    %12 = vector.broadcast %cst_4 : f32 to vector<32x1xf32>
    %13 = arith.addf %11, %12 : vector<32x1xf32>
    %14 = math.rsqrt %13 : vector<32x1xf32>
    %15 = vector.broadcast %14 : vector<32x1xf32> to vector<32x16xf32>
    %16 = arith.mulf %6, %15 : vector<32x16xf32>
    %c0_5 = arith.constant 0 : index
    %c0_6 = arith.constant 0 : index
    %17 = vector.load %arg4[%c0_5, %c0_6] : memref<1x16xf32, #tpu.memory_space<vmem>>, vector<1x16xf32>
    %18 = vector.broadcast %17 : vector<1x16xf32> to vector<32x16xf32>
    %19 = arith.mulf %16, %18 : vector<32x16xf32>
    %c0_7 = arith.constant 0 : index
    %c0_8 = arith.constant 0 : index
    %20 = vector.load %arg5[%c0_7, %c0_8] : memref<1x16xf32, #tpu.memory_space<vmem>>, vector<1x16xf32>
    %21 = vector.broadcast %20 : vector<1x16xf32> to vector<32x16xf32>
    %22 = arith.addf %19, %21 : vector<32x16xf32>
    %c0_9 = arith.constant 0 : index
    %c0_10 = arith.constant 0 : index
    %23 = vector.load %arg2[%c0_9, %c0_10] : memref<16x384xf32, #tpu.memory_space<vmem>>, vector<16x384xf32>
    %cst_11 = arith.constant dense<0.000000e+00> : vector<32x384xf32>
    %24 = tpu.matmul %22, %23, %cst_11 {dimension_numbers = #tpu.dot_dimension_numbers<[1], [0], [0], [1], [0, 0, 1, 1], [], []>} : vector<32x16xf32>, vector<16x384xf32>, vector<32x384xf32> -> vector<32x384xf32>
    %c0_12 = arith.constant 0 : index
    %c0_13 = arith.constant 0 : index
    %25 = vector.load %arg3[%c0_12, %c0_13] : memref<1x384xf32, #tpu.memory_space<vmem>>, vector<1x384xf32>
    %26 = vector.broadcast %25 : vector<1x384xf32> to vector<32x384xf32>
    %27 = arith.addf %24, %26 : vector<32x384xf32>
    %c0_14 = arith.constant 0 : index
    %c0_15 = arith.constant 0 : index
    %28 = vector.load %arg6[%c0_14, %c0_15] : memref<32x384xf32, #tpu.memory_space<vmem>>, vector<32x384xf32>
    tpu.vector_store %arg6[%c0_14, %c0_15], %27 {strides = array<i32>} : memref<32x384xf32, #tpu.memory_space<vmem>>, vector<32x384xf32>,
    return
  }
  func.func @transform_0(%arg0: i32) -> (i32, i32) {
    %c0_i32 = arith.constant 0 : i32
    %c0_i32_0 = arith.constant 0 : i32
    return %arg0, %c0_i32 : i32, i32
  }
  func.func @transform_1(%arg0: i32) -> (i32, i32) {
    %c0_i32 = arith.constant 0 : i32
    %c0_i32_0 = arith.constant 0 : i32
    %c0_i32_1 = arith.constant 0 : i32
    return %c0_i32, %c0_i32_0 : i32, i32
  }
  func.func @transform_2(%arg0: i32) -> (i32, i32) {
    %c0_i32 = arith.constant 0 : i32
    %c0_i32_0 = arith.constant 0 : i32
    %c0_i32_1 = arith.constant 0 : i32
    return %c0_i32, %c0_i32_0 : i32, i32
  }
  func.func @transform_3(%arg0: i32) -> (i32, i32) {
    %c0_i32 = arith.constant 0 : i32
    %c0_i32_0 = arith.constant 0 : i32
    %c0_i32_1 = arith.constant 0 : i32
    return %c0_i32, %c0_i32_0 : i32, i32
  }
  func.func @transform_4(%arg0: i32) -> (i32, i32) {
    %c0_i32 = arith.constant 0 : i32
    %c0_i32_0 = arith.constant 0 : i32
    %c0_i32_1 = arith.constant 0 : i32
    return %c0_i32, %c0_i32_0 : i32, i32
  }
  func.func @transform_5(%arg0: i32) -> (i32, i32) {
    %c0_i32 = arith.constant 0 : i32
    %c0_i32_0 = arith.constant 0 : i32
    return %arg0, %c0_i32 : i32, i32
  }
}

</mosaic_0001>

<bundles_post_ra>
// kernel: tpu_custom_call.1
= control target key start
LH: loop header
LB: loop body
LE: loop exit
PB: predicated region body
PF: predicated region fallthrough
CT: control target
= control target key end

     0   :  { %vm25_vm0 = vcmask 130048   ;;  %s511_s0 = inlined_call_operand.vmem [shape: f32[32,16], index: 0, kind: input, shape index: {}]   ;;  %s512_s1 = inlined_call_operand.vmem [shape: f32[16,384], index: 1, kind: input, shape index: {}]   ;;  %s513_s2 = inlined_call_operand.vmem [shape: f32[1,384], index: 2, kind: input, shape index: {}]   ;;  %s514_s3 = inlined_call_operand.vmem [shape: f32[1,16], index: 3, kind: input, shape index: {}]   ;;  %s515_s4 = inlined_call_operand.vmem [shape: f32[1,16], index: 4, kind: input, shape index: {}]   ;;  %s516_s5 = inlined_call_operand.hbm [shape: f32[32,384], index: 5, kind: output, shape index: {}]  }
   0x1   :  { %v21_v0 = vld [vmem:[%s511_s0] sm:$0xff]  ;;  %v22_v1 = vld [vmem:[%s511_s0 + $0x8] sm:$0xff]  ;;  %v24_v2 = vld [vmem:[%s511_s0 + $0x18] sm:$0xff] }
   0x2   :  { %v26_v3 = vsel %vm25_vm0, %v21_v0, 0.0  ;;  %v29_v4 = vsel %vm25_vm0, %v22_v1, 0.0  ;;  %v23_v5 = vld [vmem:[%s511_s0 + $0x10] sm:$0xff] }
   0x3   :  { %10 = vsyncpa [#allocation3], 0  ;;  %27 = vadd.xlane.f32.xlu0 %v26_v3  ;;  %30 = vadd.xlane.f32.xlu1 %v29_v4  ;;  %v35_v6 = vsel %vm25_vm0, %v24_v2, 0.0  ;;  %v32_v7 = vsel %vm25_vm0, %v23_v5, 0.0  ;;  %v102_v28 = vld [vmem:[%s512_s1 + $0x8] sm:$0xff]  ;;  %v105_v29 = vld [vmem:[%s512_s1 + $0x20] sm:$0xff]  ;;  %v109_v4 = vlaneseq }
   0x4   :  { %v101_v30 = vld [vmem:[%s512_s1] sm:$0xff]  ;;  %v364_v31 = vpack.c.bf16 %v105_v29, %v102_v28  ;;  %v104_v32 = vld [vmem:[%s512_s1 + $0x18] sm:$0xff]  ;;  %v410_v33 = vmov 0.0   ;;  %v103_v35 = vld [vmem:[%s512_s1 + $0x10] sm:$0xff] }
   0x5   :  { %200 = vmatprep.mubr.f32.mxu0 %v410_v33  ;;  %218 = vmatprep.mubr.f32.mxu1 %v410_v33  ;;  %v366_v34 = vpack.c.bf16 %v104_v32, %v101_v30  ;;  %v106_v36 = vld [vmem:[%s512_s1 + $0x28] sm:$0xff]  ;;  %v338_v51 = vld [vmem:[%s514_s3] ss:$0 sm:$0xff] }
   0x6   :  { %365 = vmatprep.subr.bf16.mxu0 %v364_v31  ;;  %372 = vmatprep.subr.bf16.mxu1 %v364_v31  ;;  %v368_v37 = vpack.c.bf16 %v106_v36, %v103_v35  ;;  %v339_v53 = vld [vmem:[%s515_s4] ss:$0 sm:$0xff] }
   0x7   :  { %36 = vadd.xlane.f32.xlu0 %v35_v6  ;;  %33 = vadd.xlane.f32.xlu1 %v32_v7  ;;  %v107_v7 = vld [vmem:[%s513_s2] sm:$0x7]  ;;  %s411_s2 = smov [#allocation2]  }
   0x8   :  { %367 = vmatpush1.bf16.msra.mxu0 %v366_v34  ;;  %373 = vmatpush1.bf16.msra.mxu1 %v366_v34  ;;  %s327_s15 = sshll.u32 %s411_s2, 4  ;;  %s328_s15 = int_to_ptr.vmem [resolvable:$true] %s327_s15 }
   0x9   :  { %369 = vmatprep.subr.bf16.mxu1 %v368_v37  ;;  %s386_s16 = scalar_lea.vmem %s328_s15, 1536  ;;  %p391_p1 = scmp.lt.s32.totalorder %s328_s15, %s328_s15 }
   0xa   :  { %p387_p0 = scmp.ne.s32.totalorder %s328_s15, %s386_s16  ;;  %p392_p2 = scmp.lt.s32.totalorder %s386_s16, %s386_s16 }
   0xc   :  { %p393_p3 = por %p392_p2, %p391_p1 }
   0xe   :  { %p394_p4 = pnand %p393_p3, %p387_p0 }
  0x90   :  { %v28_v8 = vpop.xlane.xlu0 %27  ;;  %v31_v9 = vpop.xlane.xlu1 %30 }
  0x91   :  { %v39_v10 = vmul.f32 0.0625, %v28_v8  ;;  %v40_v11 = vmul.f32 0.0625, %v31_v9 }
  0x93   :  { %v43_v12 = vsub.f32 %v21_v0, %v39_v10  ;;  %v44_v13 = vsub.f32 %v22_v1, %v40_v11 }
  0x94   :  { %v37_v14 = vpop.xlane.xlu0 %36  ;;  %v34_v15 = vpop.xlane.xlu1 %33 }
  0x95   :  { %v42_v16 = vmul.f32 0.0625, %v37_v14  ;;  %v41_v17 = vmul.f32 0.0625, %v34_v15  ;;  %v47_v18 = vmul.f32 %v43_v12, %v43_v12  ;;  %v48_v19 = vmul.f32 %v44_v13, %v44_v13 }
  0x97   :  { %v46_v20 = vsub.f32 %v24_v2, %v42_v16  ;;  %v45_v21 = vsub.f32 %v23_v5, %v41_v17  ;;  %v51_v22 = vsel %vm25_vm0, %v47_v18, 0.0  ;;  %v54_v23 = vsel %vm25_vm0, %v48_v19, 0.0 }
  0x98   :  { %52 = vadd.xlane.f32.xlu0 %v51_v22  ;;  %v110_v5 = vshrl.u32 %v109_v4, 7 }
  0x99   :  { %v50_v24 = vmul.f32 %v46_v20, %v46_v20  ;;  %v49_v25 = vmul.f32 %v45_v21, %v45_v21 }
  0x9a   :  { %v111_v6 = vsub.s32 0, %v110_v5  ;;  %v115_v8 = vsub.s32 1, %v110_v5  ;;  %v119_v14 = vsub.s32 2, %v110_v5 }
  0x9b   :  { %v60_v26 = vsel %vm25_vm0, %v50_v24, 0.0  ;;  %v57_v27 = vsel %vm25_vm0, %v49_v25, 0.0 }
  0x9c   :  { %55 = vadd.xlane.f32.xlu0 %v54_v23  ;;  %61 = vadd.xlane.f32.xlu1 %v60_v26  ;;  %v112_v9 = vrot.slane %v107_v7, %v111_v6  ;;  %v116_v10 = vrot.slane %v107_v7, %v115_v8 }
  0xa0   :  { %58 = vadd.xlane.f32.xlu1 %v57_v27 }
 0x125   :  { %v53_v38 = vpop.xlane.xlu0 %52 }
 0x126   :  { %v63_v39 = vmul.f32 0.0625, %v53_v38 }
 0x128   :  { %v67_v40 = vadd.f32 1e-05, %v63_v39 }
 0x129   :  { %v62_v41 = vpop.xlane.xlu1 %61  ;;  %v56_v42 = vpop.xlane.xlu0 %55 }
 0x12a   :  { %378 = vrsqrt.f32 %v67_v40  ;;  %v66_v43 = vmul.f32 0.0625, %v62_v41  ;;  %v64_v44 = vmul.f32 0.0625, %v56_v42 }
 0x12c   :  { %v70_v45 = vadd.f32 1e-05, %v66_v43  ;;  %v68_v46 = vadd.f32 1e-05, %v64_v44 }
 0x12d   :  { %v59_v47 = vpop.xlane.xlu1 %58 }
 0x12e   :  { %380 = vrsqrt.f32 %v70_v45  ;;  %v65_v48 = vmul.f32 0.0625, %v59_v47 }
 0x12f   :  { %382 = vrsqrt.f32 %v68_v46 }
 0x130   :  { %v69_v49 = vadd.f32 1e-05, %v65_v48 }
 0x132   :  { %384 = vrsqrt.f32 %v69_v49 }
 0x134   :  { %v379_v50 = vpop.eup %378 }
 0x135   :  { %v75_v52 = vmul.f32 %v379_v50, %v43_v12 }
 0x137   :  { %v86_v54 = vmul.f32 %v338_v51, %v75_v52 }
 0x138   :  { %v381_v55 = vpop.eup %380 }
 0x139   :  { %v383_v56 = vpop.eup %382  ;;  %v97_v57 = vadd.f32 %v339_v53, %v86_v54  ;;  %v78_v58 = vmul.f32 %v381_v55, %v46_v20  ;;  %v120_v20 = vrot.slane %v107_v7, %v119_v14 }
 0x13a   :  { %v76_v59 = vmul.f32 %v383_v56, %v44_v13 }
 0x13b   :  { %340 = vmatmul.mubr.msk.f32.vlgmr.msra.gmra.mrb[0].mxu0 %vm25_vm0, %v97_v57  ;;  %v89_v60 = vmul.f32 %v338_v51, %v78_v58 }
 0x13c   :  { %v385_v61 = vpop.eup %384  ;;  %206 = vmatprep.mubr.f32.mxu0 %v410_v33  ;;  %v87_v62 = vmul.f32 %v338_v51, %v76_v59 }
 0x13d   :  { %v100_v63 = vadd.f32 %v339_v53, %v89_v60  ;;  %v77_v0 = vmul.f32 %v385_v61, %v45_v21 }
 0x13e   :  { %v98_v1 = vadd.f32 %v339_v53, %v87_v62 }
 0x13f   :  { %343 = vmatmul.mubr.msk.f32.vlgmr.msra.gmra.mrb[0].mxu1 %vm25_vm0, %v100_v63  ;;  %v88_v2 = vmul.f32 %v338_v51, %v77_v0 }
 0x140   :  { %341 = vmatmul.mubr.msk.f32.gmra.mrb[2].mxu0 %vm25_vm0, %v98_v1  ;;  %371 = vmatpush3.bf16.msra.mxu1 %v368_v37 }
 0x141   :  { %358 = vmatprep.mubr.msk.f32.mxu1 %vm25_vm0, %v97_v57  ;;  %212 = vmatprep.mubr.f32.mxu0 %v410_v33  ;;  %v99_v3 = vadd.f32 %v339_v53, %v88_v2 }
 0x143   :  { %359 = vmatmul.mubr.msk.f32.vlgmr.msra.gmra.mrb[2].mxu1 %vm25_vm0, %v98_v1 }
 0x144   :  { %342 = vmatmul.mubr.msk.f32.gmra.mrb[4].mxu0 %vm25_vm0, %v99_v3  ;;  %361 = vmatprep.mubr.msk.f32.mxu1 %vm25_vm0, %v99_v3 }
 0x147   :  { %362 = vmatmul.mubr.msk.f32.gmra.mrb[4].mxu1 %vm25_vm0, %v100_v63 }
 0x20e   :  { %v202_v11 = vpop.f32.mrb[0].mxu0 }
 0x20f   :  { %v203_v12 = vadd.f32 %v202_v11, %v112_v9  ;;  %v204_v13 = vpop.f32.mrb[1].mxu0 }
 0x210   :  { %v205_v15 = vadd.f32 %v204_v13, %v116_v10 }
 0x211   :  { %310 = vst [vmem:[#allocation2] sm:$0xff] %v203_v12 }
 0x212   :  { %311 = vst [vmem:[#allocation2 + $0x8] sm:$0xff] %v205_v15  ;;  %v220_v16 = vpop.f32.mrb[0].mxu1 }
 0x213   :  { %v208_v17 = vpop.f32.mrb[2].mxu0  ;;  %v221_v18 = vadd.f32 %v220_v16, %v112_v9  ;;  %v222_v19 = vpop.f32.mrb[1].mxu1 }
 0x214   :  { %v209_v21 = vadd.f32 %v208_v17, %v112_v9  ;;  %v210_v22 = vpop.f32.mrb[3].mxu0  ;;  %v223_v23 = vadd.f32 %v222_v19, %v116_v10 }
 0x215   :  { %319 = vst [vmem:[#allocation2 + $0x48] sm:$0xff] %v221_v18  ;;  %v211_v24 = vadd.f32 %v210_v22, %v116_v10 }
 0x216   :  { %313 = vst [vmem:[#allocation2 + $0x18] sm:$0xff] %v209_v21  ;;  %320 = vst [vmem:[#allocation2 + $0x50] sm:$0xff] %v223_v23  ;;  %v360_v25 = vpop.f32.mrb[2].mxu1 }
 0x217   :  { %314 = vst [vmem:[#allocation2 + $0x20] sm:$0xff] %v211_v24  ;;  %v214_v26 = vpop.f32.mrb[4].mxu0  ;;  %v297_v27 = vadd.f32 %v360_v25, %v120_v20  ;;  %v291_v28 = vpop.f32.mrb[3].mxu1 }
 0x218   :  { %v215_v29 = vadd.f32 %v214_v26, %v112_v9  ;;  %v216_v30 = vpop.f32.mrb[5].mxu0  ;;  %v292_v31 = vadd.f32 %v291_v28, %v120_v20 }
 0x219   :  { %315 = vst [vmem:[#allocation2 + $0x28] sm:$0xff] %v297_v27  ;;  %v217_v32 = vadd.f32 %v216_v30, %v116_v10 }
 0x21a   :  { %316 = vst [vmem:[#allocation2 + $0x30] sm:$0xff] %v215_v29  ;;  %312 = vst [vmem:[#allocation2 + $0x10] sm:$0xff] %v292_v31  ;;  %v363_v33 = vpop.f32.mrb[4].mxu1 }
 0x21b   :  { %317 = vst [vmem:[#allocation2 + $0x38] sm:$0xff] %v217_v32  ;;  %v307_v34 = vadd.f32 %v363_v33, %v120_v20  ;;  %v301_v35 = vpop.f32.mrb[5].mxu1 }
 0x21c   :  { %v302_v36 = vadd.f32 %v301_v35, %v120_v20 }
 0x21d   :  { %321 = vst [vmem:[#allocation2 + $0x58] sm:$0xff] %v307_v34 }
 0x21e   :  { %318 = vst [vmem:[#allocation2 + $0x40] sm:$0xff] %v302_v36 }
 0x21f   :  { %397 = shalt.err (!%p394_p4)
}
 0x220   :  { %s398_s19 = scalar_lea.hbm %s516_s5, 1536 }
 0x221   :  { %p399_p5 = scmp.ne.s32.totalorder %s516_s5, %s398_s19  ;;  %p402_p6 = scmp.lt.u32.totalorder %s398_s19, %s516_s5 }
 0x223   :  { %p404_p7 = pnand %p402_p6, %p399_p5 }
 0x225   :  { %407 = shalt.err (!%p404_p7)
}
 0x226   :  { %s412_s24 = smov 384   ;;  %s413_s25 = smov 24  }
 0x227   :  { %333 = dma.vmem_to_hbm [thread:$0]  %s328_s15, 1536, %s516_s5, [#allocation3], %s412_s24, %s412_s24, %s413_s25  }
 0x228   :  { %408 = dma.done.wait [#allocation3], 1536  }
 0x229   :  { %409 = vsyncadd [#allocation3], 4294965760 }
 0x22a   :  { %337 = vsyncpa [#allocation3], 1 }

</bundles_post_ra>
